<compile_context>
chip_gen: v7x
topology: tpu7x:2x2x1
jax: 0.10.0
libtpu: 0.0.40
codegen_flags: <defaults>
</compile_context>

<pallas_src>
import functools

import jax
import jax.numpy as jnp
from jax.experimental import pallas as pl
from jax.experimental.pallas import tpu as pltpu


LANE = 128
_PER_BUFFER_BUDGET = 4 << 20   # ~4 MiB per VMEM buffer (review: ~86% of HBM roofline)
_VMEM_LIMIT_BYTES = 48 << 20   # explicit scoped-VMEM limit: covers double-buffered
                               # x + out + pe on v5e (16 MiB default) and stays
                               # under v7x's 64 MiB physical VMEM


# ----------------------------- Pallas kernel -------------------------------

def _broadcast_add_kernel(x_ref, pe_ref, o_ref):
    # x_ref: (Bb, TR, 128), pe_ref: (TR, 128) -> broadcast add over the batch block.
    o_ref[...] = x_ref[...] + pe_ref[...][None]


# ------------------------------ tiling helpers -----------------------------

def _sublane_multiple(itemsize: int) -> int:
    # Native sublane packing: 8 rows for 4-byte, 16 for 2-byte, 32 for 1-byte dtypes.
    return 8 * max(1, 4 // int(itemsize))


def _choose_tiles(B, R, itemsize):
    """Pick (batch_block, row_tile) so one buffer is <= ~_PER_BUFFER_BUDGET bytes."""
    sub = _sublane_multiple(itemsize)
    row_bytes = R * LANE * itemsize            # bytes of one batch element (all rows)
    if row_bytes <= _PER_BUFFER_BUDGET:
        tile_rows = R                          # full row extent (always a legal block)
        bb = int(max(1, min(B, _PER_BUFFER_BUDGET // max(row_bytes, 1))))
    else:
        bb = 1
        max_rows = _PER_BUFFER_BUDGET // (LANE * itemsize)
        tile_rows = int(min(R, max(sub, max_rows - (max_rows % sub))))
    return bb, tile_rows


# ------------------------------ JAX wrappers -------------------------------

@functools.partial(jax.jit, static_argnames=("bb", "tile_rows"))
def _pallas_broadcast_add(x3, pe2, *, bb, tile_rows):
    """out[b, r, c] = x3[b, r, c] + pe2[r, c]; x3 is (B, R, 128), pe2 is (R, 128)."""
    B, R, C = x3.shape
    grid = (pl.cdiv(R, tile_rows), pl.cdiv(B, bb))
    # Batch is the FAST (trailing) grid axis: pe's block index depends only on
    # the row tile, so it is constant across consecutive steps and Pallas
    # elides its repeated DMA (pe is read once per row tile, not once per
    # batch block).  Rows lead so megacore splits rows across TensorCores.
    x_spec = pl.BlockSpec((bb, tile_rows, C), lambda r, b: (b, r, 0))
    pe_spec = pl.BlockSpec((tile_rows, C), lambda r, b: (r, 0))
    out_spec = pl.BlockSpec((bb, tile_rows, C), lambda r, b: (b, r, 0))

    return pl.pallas_call(
        _broadcast_add_kernel,
        out_shape=jax.ShapeDtypeStruct(x3.shape, x3.dtype),
        grid_spec=pltpu.PrefetchScalarGridSpec(
            num_scalar_prefetch=0,
            grid=grid,
            in_specs=[x_spec, pe_spec],
            out_specs=out_spec,
        ),
        compiler_params=pltpu.CompilerParams(
            dimension_semantics=("parallel", "parallel"),
            vmem_limit_bytes=_VMEM_LIMIT_BYTES,
        ),
    )(x3, pe2)


def _pair(t):
    return tuple(t) if isinstance(t, (tuple, list)) else (t, t)


def _interp_matrix_1d(out_size: int, in_size: int) -> jnp.ndarray:
    """Dense 1-D bilinear interpolation matrix matching
    F.interpolate(mode='bilinear', align_corners=False) along one axis."""
    if out_size == in_size:
        return jnp.eye(out_size, dtype=jnp.float32)
    scale = in_size / out_size
    dst = jnp.arange(out_size, dtype=jnp.float32)
    src = (dst + 0.5) * scale - 0.5
    src = jnp.clip(src, 0.0, float(in_size - 1))
    i0 = jnp.floor(src).astype(jnp.int32)
    i1 = jnp.minimum(i0 + 1, in_size - 1)
    frac = src - i0.astype(jnp.float32)
    a = (jax.nn.one_hot(i0, in_size, dtype=jnp.float32) * (1.0 - frac)[:, None]
         + jax.nn.one_hot(i1, in_size, dtype=jnp.float32) * frac[:, None])
    return a


class PVTPosEmbeddingPallas:
    """JAX/Pallas re-implementation of vformer's PVTPosEmbedding forward."""

    def __init__(self, pos_shape, pos_dim, p_dropout=0.0, std=0.02,
                 key=jax.random.PRNGKey(0)):
        pos_shape = _pair(pos_shape)
        self.pos_shape = pos_shape
        self.pos_dim = pos_dim
        self.p_dropout = p_dropout
        # trunc_normal_(std=std): deterministic synthetic init.
        self.pos_embed = std * jax.random.truncated_normal(
            key, -2.0, 2.0, (1, pos_shape[0] * pos_shape[1], pos_dim),
            dtype=jnp.float32)
        # Caches: (H, W) -> resized f32 pos embed; (L, H, W, dtype) -> lane-dense pe.
        self._resize_cache = {}
        self._pe2_cache = {}
        # TODO(synk): training-mode dropout (p_dropout > 0) not implemented; the
        # default p_dropout=0.0 makes nn.Dropout an identity, which is exact.

    def _resized_pos_embed(self, H, W):
        key = (int(H), int(W))
        if key not in self._resize_cache:
            pos_h, pos_w = self.pos_shape
            pos = self.pos_embed[0].reshape(pos_h, pos_w, self.pos_dim)
            a_h = _interp_matrix_1d(H, pos_h)   # (H, pos_h)
            a_w = _interp_matrix_1d(W, pos_w)   # (W, pos_w)
            # Separable bilinear resize as two tiny matmuls (runs once per (H, W)).
            t = jnp.einsum("wj,hjc->hwc", a_w, pos)    # (pos_h, W, C)
            pe = jnp.einsum("hi,iwc->hwc", a_h, t)     # (H, W, C)
            self._resize_cache[key] = pe.reshape(H * W, self.pos_dim)
        return self._resize_cache[key]

    def _lane_dense_pe(self, L, H, W, dtype):
        """Cached lane-dense (R, 128) positional embedding in x's dtype."""
        ck = (int(L), int(H), int(W), jnp.dtype(dtype).name)
        if ck not in self._pe2_cache:
            pos_h, pos_w = self.pos_shape
            if L == pos_h * pos_w:
                # Same shape: plain broadcast add (the PyTorch `try:` branch).
                pe = self.pos_embed[0]
            else:
                assert L == H * W, "sequence length must equal H * W"
                pe = self._resized_pos_embed(H, W)
            # NOTE: pe is cast to x.dtype before the add; for bf16 inputs this
            # rounds pe once (tiny deviation from an f32-accumulate reference)
            # and halves its DMA bytes.
            flat = pe.astype(dtype).reshape(-1)
            pad = (-flat.shape[0]) % LANE
            if pad:
                flat = jnp.pad(flat, (0, pad))
            self._pe2_cache[ck] = flat.reshape(-1, LANE)
        return self._pe2_cache[ck]

    def __call__(self, x, H, W, mode="bilinear"):
        assert mode == "bilinear", "only bilinear resize is implemented"
        B, L, C = x.shape
        pe2 = self._lane_dense_pe(L, H, W, x.dtype)

        # Lane-dense layout: flatten (L, C) and pad the flat axis to a multiple
        # of 128 if needed, so every store is an unmasked full-width vst.
        LC = L * C
        pad = (-LC) % LANE
        x_flat = x.reshape(B, LC)
        if pad:
            x_flat = jnp.pad(x_flat, ((0, 0), (0, pad)))
        R = (LC + pad) // LANE
        x3 = x_flat.reshape(B, R, LANE)

        itemsize = jnp.dtype(x.dtype).itemsize
        bb, tile_rows = _choose_tiles(B, R, itemsize)
        out3 = _pallas_broadcast_add(x3, pe2, bb=bb, tile_rows=tile_rows)

        out = out3.reshape(B, R * LANE)
        if pad:
            out = out[:, :LC]
        return out.reshape(B, L, C)


# ---------------------------------- main -----------------------------------

if __name__ == "__main__":
    key = jax.random.PRNGKey(0)
    k_pos, k_x1, k_x2, k_pos3, k_x3 = jax.random.split(key, 5)

    pos_shape = 8          # pos_h = pos_w = 8  ->  L_pos = 64
    pos_dim = 32
    B = 2

    module = PVTPosEmbeddingPallas(pos_shape, pos_dim, p_dropout=0.0,
                                   std=0.02, key=k_pos)

    # Case 1: sequence length matches the stored pos_embed (direct add path).
    H1 = W1 = 8
    x1 = jax.random.normal(k_x1, (B, H1 * W1, pos_dim), dtype=jnp.float32)
    out1 = module(x1, H1, W1)
    jax.block_until_ready(out1)

    # Case 2: mismatched sequence length -> bilinear resize of pos_embed.
    H2 = W2 = 4
    x2 = jax.random.normal(k_x2, (B, H2 * W2, pos_dim), dtype=jnp.float32)
    out2 = module(x2, H2, W2)
    jax.block_until_ready(out2)

    # Case 3: L*C not a multiple of 128 -> padded lane-dense path.
    module3 = PVTPosEmbeddingPallas(5, 9, p_dropout=0.0, std=0.02, key=k_pos3)
    H3 = W3 = 5
    x3 = jax.random.normal(k_x3, (B, H3 * W3, 9), dtype=jnp.float32)
    out3 = module3(x3, H3, W3)
    jax.block_until_ready(out3)

    # Lightweight correctness checks against pure-JAX references.
    ref1 = x1 + module.pos_embed
    assert jnp.allclose(out1, ref1, atol=1e-6), "direct-add path mismatch"

    a_h = _interp_matrix_1d(H2, pos_shape)
    a_w = _interp_matrix_1d(W2, pos_shape)
    m_ref = (a_h[:, None, :, None] * a_w[None, :, None, :]).reshape(
        H2 * W2, pos_shape * pos_shape)
    ref2 = x2 + (m_ref @ module.pos_embed[0])[None]
    assert jnp.allclose(out2, ref2, atol=1e-5), "resize-add path mismatch"

    ref3 = x3 + module3.pos_embed
    assert jnp.allclose(out3, ref3, atol=1e-6), "padded lane-dense path mismatch"

    assert out1.shape == (B, H1 * W1, pos_dim)
    assert out2.shape == (B, H2 * W2, pos_dim)
    assert out3.shape == (B, H3 * W3, 9)

    print("KERNEL_OK")
</pallas_src>

<mosaic_0001>
module attributes {stable_mosaic.version = 11 : i64} {
  func.func @_broadcast_add_kernel(%arg0: i32, %arg1: i32, %arg2: memref<2x16x128xf32, #tpu.memory_space<vmem>>, %arg3: memref<16x128xf32, #tpu.memory_space<vmem>>, %arg4: memref<2x16x128xf32, #tpu.memory_space<vmem>>) attributes {dimension_semantics = [#tpu.dimension_semantics<parallel>, #tpu.dimension_semantics<parallel>], iteration_bounds = array<i64: 1, 1>, scalar_prefetch = 0 : i64, scratch_operands = 0 : i64, tpu.core_type = #tpu.core_type<tc>, window_params = [{transform_indices = @transform_0, window_bounds = array<i64: 2, 16, 128>}, {transform_indices = @transform_1, window_bounds = array<i64: 16, 128>}, {transform_indices = @transform_2, window_bounds = array<i64: 2, 16, 128>}]} {
    %c0 = arith.constant 0 : index
    %c0_0 = arith.constant 0 : index
    %c0_1 = arith.constant 0 : index
    %0 = vector.load %arg2[%c0, %c0_0, %c0_1] : memref<2x16x128xf32, #tpu.memory_space<vmem>>, vector<2x16x128xf32>
    %c0_2 = arith.constant 0 : index
    %c0_3 = arith.constant 0 : index
    %1 = vector.load %arg3[%c0_2, %c0_3] : memref<16x128xf32, #tpu.memory_space<vmem>>, vector<16x128xf32>
    %2 = vector.shape_cast %1 : vector<16x128xf32> to vector<1x16x128xf32>
    %3 = vector.broadcast %2 : vector<1x16x128xf32> to vector<2x16x128xf32>
    %4 = arith.addf %0, %3 : vector<2x16x128xf32>
    %c0_4 = arith.constant 0 : index
    %c0_5 = arith.constant 0 : index
    %c0_6 = arith.constant 0 : index
    %5 = vector.load %arg4[%c0_4, %c0_5, %c0_6] : memref<2x16x128xf32, #tpu.memory_space<vmem>>, vector<2x16x128xf32>
    tpu.vector_store %arg4[%c0_4, %c0_5, %c0_6], %4 {strides = array<i32>} : memref<2x16x128xf32, #tpu.memory_space<vmem>>, vector<2x16x128xf32>,
    return
  }
  func.func @transform_0(%arg0: i32, %arg1: i32) -> (i32, i32, i32) {
    %c0_i32 = arith.constant 0 : i32
    %c0_i32_0 = arith.constant 0 : i32
    return %arg1, %arg0, %c0_i32 : i32, i32, i32
  }
  func.func @transform_1(%arg0: i32, %arg1: i32) -> (i32, i32) {
    %c0_i32 = arith.constant 0 : i32
    %c0_i32_0 = arith.constant 0 : i32
    return %arg0, %c0_i32 : i32, i32
  }
  func.func @transform_2(%arg0: i32, %arg1: i32) -> (i32, i32, i32) {
    %c0_i32 = arith.constant 0 : i32
    %c0_i32_0 = arith.constant 0 : i32
    return %arg1, %arg0, %c0_i32 : i32, i32, i32
  }
}

</mosaic_0001>

<bundles_post_ra>
// kernel: _pallas_broadcast_add.1
= control target key start
LH: loop header
LB: loop body
LE: loop exit
PB: predicated region body
PF: predicated region fallthrough
CT: control target
= control target key end

     0   :  { %7 = vsyncpa [#allocation3], 0  ;;  %s214_s0 = inlined_call_operand.hbm [shape: f32[2,16,128], index: 0, kind: input, shape index: {}]   ;;  %s215_s1 = inlined_call_operand.hbm [shape: f32[16,128], index: 1, kind: input, shape index: {}]   ;;  %s216_s2 = inlined_call_operand.hbm [shape: f32[2,16,128], index: 2, kind: output, shape index: {}]  }
   0x1   :  { %8 = vsyncpa [#allocation6], 0 }
   0x2   :  { %9 = vsyncpa [#allocation4], 0  ;;  %s149_s9 = smov [#allocation2]   ;;  %s77_s13 = scalar_lea.hbm %s214_s0, 512 }
   0x3   :  { %s15_s10 = sshll.u32 %s149_s9, 4  ;;  %p78_p0 = scmp.ne.s32.totalorder %s214_s0, %s77_s13  ;;  %s16_s10 = int_to_ptr.vmem [resolvable:$true] %s15_s10 }
   0x4   :  { %p81_p1 = scmp.lt.u32.totalorder %s77_s13, %s214_s0 }
   0x6   :  { %p83_p2 = pnand %p81_p1, %p78_p0 }
   0x8   :  { %86 = shalt.err (!%p83_p2)
}
   0x9   :  { %s87_s18 = scalar_lea.vmem %s16_s10, 512  ;;  %p92_p4 = scmp.lt.s32.totalorder %s16_s10, %s16_s10 }
   0xa   :  { %p88_p3 = scmp.ne.s32.totalorder %s16_s10, %s87_s18  ;;  %p93_p5 = scmp.lt.s32.totalorder %s87_s18, %s87_s18 }
   0xc   :  { %p94_p6 = por %p93_p5, %p92_p4 }
   0xe   :  { %p95_p7 = pnand %p94_p6, %p88_p3 }
  0x10   :  { %98 = shalt.err (!%p95_p7)
}
  0x11   :  { %s150_s19 = smov 128   ;;  %s151_s20 = smov 8  }
  0x12   :  { %21 = dma.hbm_to_vmem [thread:$0]  %s214_s0, 512, %s16_s10, [#allocation3], %s150_s19, %s150_s19, %s151_s20  }
  0x13   :  { %s152_s23 = smov [#allocation5]   ;;  %s99_s27 = scalar_lea.hbm %s215_s1, 256 }
  0x14   :  { %s27_s24 = sshll.u32 %s152_s23, 4  ;;  %p100_p8 = scmp.ne.s32.totalorder %s215_s1, %s99_s27  ;;  %s28_s24 = int_to_ptr.vmem [resolvable:$true] %s27_s24 }
  0x15   :  { %p103_p9 = scmp.lt.u32.totalorder %s99_s27, %s215_s1 }
  0x17   :  { %p105_p10 = pnand %p103_p9, %p100_p8 }
  0x19   :  { %108 = shalt.err (!%p105_p10)
}
  0x1a   :  { %s109_s4 = scalar_lea.vmem %s28_s24, 256  ;;  %p114_p12 = scmp.lt.s32.totalorder %s28_s24, %s28_s24 }
  0x1b   :  { %p110_p11 = scmp.ne.s32.totalorder %s28_s24, %s109_s4  ;;  %p115_p13 = scmp.lt.s32.totalorder %s109_s4, %s109_s4 }
  0x1d   :  { %p116_p0 = por %p115_p13, %p114_p12 }
  0x1f   :  { %p117_p1 = pnand %p116_p0, %p110_p11 }
  0x21   :  { %120 = shalt.err (!%p117_p1)
}
  0x22   :  { %33 = dma.hbm_to_vmem [thread:$0]  %s215_s1, 256, %s28_s24, [#allocation6], %s150_s19, %s150_s19, %s151_s20  }
  0x23   :  { %143 = dma.done.wait [#allocation3], 512  }
  0x24   :  { %144 = vsyncadd [#allocation3], 4294966784 }
  0x25   :  { %145 = dma.done.wait [#allocation6], 256  }
  0x26   :  { %146 = vsyncadd [#allocation6], 4294967040  ;;  %s153_s6 = smov [#allocation7]   ;;  %v40_v0 = vld [vmem:[#allocation2] sm:$0xff]  ;;  %v41_v2 = vld [vmem:[#allocation2 + $0x8] sm:$0xff] }
  0x27   :  { %s59_s7 = sshll.u32 %s153_s6, 4  ;;  %v44_v1 = vld [vmem:[#allocation5] sm:$0xff]  ;;  %v45_v4 = vld [vmem:[#allocation5 + $0x8] sm:$0xff]  ;;  %v42_v5 = vld [vmem:[#allocation2 + $0x10] sm:$0xff]  ;;  %s60_s7 = int_to_ptr.vmem [resolvable:$true] %s59_s7 }
  0x28   :  { %v46_v3 = vadd.f32 %v44_v1, %v40_v0  ;;  %v43_v6 = vld [vmem:[#allocation2 + $0x18] sm:$0xff]  ;;  %v47_v7 = vadd.f32 %v45_v4, %v41_v2  ;;  %v48_v8 = vadd.f32 %v44_v1, %v42_v5  ;;  %s121_s1 = scalar_lea.vmem %s60_s7, 512  ;;  %p126_p3 = scmp.lt.s32.totalorder %s60_s7, %s60_s7 }
  0x29   :  { %v49_v9 = vadd.f32 %v45_v4, %v43_v6  ;;  %p122_p2 = scmp.ne.s32.totalorder %s60_s7, %s121_s1  ;;  %p127_p4 = scmp.lt.s32.totalorder %s121_s1, %s121_s1 }
  0x2a   :  { %50 = vst [vmem:[#allocation7] sm:$0xff] %v46_v3  ;;  %51 = vst [vmem:[#allocation7 + $0x8] sm:$0xff] %v47_v7 }
  0x2b   :  { %52 = vst [vmem:[#allocation7 + $0x10] sm:$0xff] %v48_v8  ;;  %53 = vst [vmem:[#allocation7 + $0x18] sm:$0xff] %v49_v9  ;;  %p128_p5 = por %p127_p4, %p126_p3 }
  0x2d   :  { %p129_p6 = pnand %p128_p5, %p122_p2 }
  0x2f   :  { %132 = shalt.err (!%p129_p6)
}
  0x30   :  { %s133_s10 = scalar_lea.hbm %s216_s2, 512 }
  0x31   :  { %p134_p7 = scmp.ne.s32.totalorder %s216_s2, %s133_s10  ;;  %p137_p8 = scmp.lt.u32.totalorder %s133_s10, %s216_s2 }
  0x33   :  { %p139_p9 = pnand %p137_p8, %p134_p7 }
  0x35   :  { %142 = shalt.err (!%p139_p9)
}
  0x36   :  { %65 = dma.vmem_to_hbm [thread:$0]  %s60_s7, 512, %s216_s2, [#allocation4], %s150_s19, %s150_s19, %s151_s20  }
  0x37   :  { %147 = dma.done.wait [#allocation4], 512  }
  0x38   :  { %148 = vsyncadd [#allocation4], 4294966784 }
  0x39   :  { %69 = vsyncpa [#allocation3], 1 }
  0x3a   :  { %70 = vsyncpa [#allocation6], 1 }
  0x3b   :  { %71 = vsyncpa [#allocation4], 1 }

</bundles_post_ra>
